<compile_context>
chip_gen: v7x
topology: tpu7x:2x2x1
jax: 0.10.0
libtpu: 0.0.40
codegen_flags: <defaults>
</compile_context>

<pallas_src>
import functools

import jax
import jax.numpy as jnp
import numpy as np
from jax.experimental import pallas as pl
from jax.experimental.pallas import tpu as pltpu

BN_EPS = 1e-5
_SUBLANE = 8  # pad tiny param operands to a full sublane group


def gnn_frames_kernel(x_ref, a_ref, w_ref, pp_ref, o_ref, *, compute_dtype):
    # One grid step == F_BLK frames (F_BLK graphs of `num_nodes` nodes).
    f_blk, n_nodes, in_dim = x_ref.shape
    m_blk = f_blk * n_nodes

    x = x_ref[...].astype(compute_dtype)                       # (F, N, I)
    w = w_ref[...].astype(compute_dtype)                       # (I, 64)
    adj = a_ref[...].astype(compute_dtype)                     # (N, N)

    # --- (1) feature transform: one big-M GEMM over the whole frame block ---
    xw = jax.lax.dot_general(
        x.reshape(m_blk, in_dim), w,
        dimension_numbers=(((1,), (0,)), ((), ())),
        preferred_element_type=jnp.float32)                    # (F*N, 64)

    # --- (2) adjacency mixing: batched matmul, frames as the batch dim ------
    xw3 = xw.reshape(f_blk, n_nodes, -1).astype(compute_dtype)  # (F, N, 64)
    adj_b = jnp.broadcast_to(adj, (f_blk, n_nodes, n_nodes))    # (F, N, N)
    h = jax.lax.dot_general(
        adj_b, xw3,
        dimension_numbers=(((2,), (1,)), ((0,), (0,))),
        preferred_element_type=jnp.float32)                     # (F, N, 64)
    h = jnp.maximum(h, 0.0)                                     # ReLU (f32 epilogue)

    # --- (3) pooling with BatchNorm folded into the weights -----------------
    # pooled[m] = sum_d h[m, d] * pw_eff[d] + <shift, pool_w>
    # Computed as pw_eff^T @ h^T so the result is lane-major -> lane-dense store.
    h_flat = h.reshape(m_blk, -1)                               # (F*N, 64)
    pp = pp_ref[...]                                            # (8, 64): row0=pw_eff, row1=shift*pool_w
    pooled_all = jax.lax.dot_general(
        pp, h_flat,
        dimension_numbers=(((1,), (1,)), ((), ())),
        preferred_element_type=jnp.float32)                     # (8, F*N)
    bias = jnp.sum(pp_ref[1:2, :])                              # scalar <shift, pool_w>
    pooled = pooled_all[0:1, :] + bias                          # (1, F*N)

    o_ref[...] = pooled.reshape(1, 1, m_blk).astype(o_ref.dtype)


def gnn_for_frames_forward(x, adj, w, gamma, beta, run_mean, run_var, pool_w,
                           batch_size, time_len, *, average=False,
                           f_blk=None, compute_dtype=jnp.float32):
    frames, num_nodes, in_dim = x.shape
    out_dim = w.shape[1]
    assert frames == batch_size * time_len

    # --- fold eval-mode BatchNorm into the pooling weights (applied post-ReLU) ---
    inv_std = jax.lax.rsqrt(run_var.astype(jnp.float32) + BN_EPS)
    scale = (gamma * inv_std).reshape(out_dim)                      # gamma / sqrt(var+eps)
    shift = (beta - run_mean * gamma * inv_std).reshape(out_dim)    # beta - mean*scale
    if average:
        # sum over feature dim == pooling with all-ones weights
        pw_eff, bias_terms = scale, shift
    else:
        pw_eff = scale * pool_w.reshape(out_dim)
        bias_terms = shift * pool_w.reshape(out_dim)
    pool_params = (jnp.zeros((_SUBLANE, out_dim), jnp.float32)
                   .at[0].set(pw_eff.astype(jnp.float32))
                   .at[1].set(bias_terms.astype(jnp.float32)))

    # --- pick how many frames to batch per grid step -----------------------
    if f_blk is None:
        best = None
        for d in range(1, frames + 1):
            if frames % d:
                continue
            m = d * num_nodes
            cand = ((m % 128) == 0,        # lane-dense output rows
                    (frames // d) >= 2,     # >=2 blocks feeds both v7x TensorCores
                    m <= 4096,              # keep per-block VMEM modest
                    d)
            if best is None or cand > best:
                best = cand
        f_blk = best[3]
    assert frames % f_blk == 0
    num_blocks = frames // f_blk
    m_blk = f_blk * num_nodes

    kernel = functools.partial(gnn_frames_kernel, compute_dtype=compute_dtype)

    out = pl.pallas_call(
        kernel,
        out_shape=jax.ShapeDtypeStruct((num_blocks, 1, m_blk), jnp.float32),
        grid_spec=pltpu.PrefetchScalarGridSpec(
            num_scalar_prefetch=0,
            grid=(num_blocks,),
            in_specs=[
                # node features: F_BLK frames per block
                pl.BlockSpec((f_blk, num_nodes, in_dim), lambda f: (f, 0, 0)),
                # shared operands: constant index_map -> stay VMEM-resident
                pl.BlockSpec((num_nodes, num_nodes), lambda f: (0, 0)),    # adjacency
                pl.BlockSpec((in_dim, out_dim), lambda f: (0, 0)),         # gnn W
                pl.BlockSpec((_SUBLANE, out_dim), lambda f: (0, 0)),       # packed pool params
            ],
            out_specs=pl.BlockSpec((1, 1, m_blk), lambda f: (f, 0, 0)),    # lane-dense slab
        ),
        compiler_params=pltpu.CompilerParams(
            dimension_semantics=("parallel",),
            vmem_limit_bytes=32 * 1024 * 1024),
    )(x, adj, w, pool_params)

    # (num_blocks, 1, F_BLK*num_nodes) -> (batch, time, num_nodes); frame-major order matches.
    return out.reshape(batch_size, time_len, num_nodes)


def reference_forward(x, adj, w, gamma, beta, run_mean, run_var, pool_w,
                      batch_size, time_len, *, average=False):
    """Pure-JAX reference mirroring the PyTorch forward (BN not folded)."""
    frames, num_nodes, _ = x.shape
    xw = jnp.einsum('fni,id->fnd', x, w)
    h = jnp.maximum(jnp.einsum('nm,fmd->fnd', adj, xw), 0.0)
    h = (h - run_mean.reshape(-1)) / jnp.sqrt(run_var.reshape(-1) + BN_EPS) \
        * gamma.reshape(-1) + beta.reshape(-1)
    h = h.reshape(batch_size, time_len, num_nodes, -1)
    if average:
        return jnp.sum(h, axis=-1)
    return jnp.einsum('btnd,do->btn', h, pool_w)


if __name__ == "__main__":
    batch_size = 2
    time_len = 8
    num_nodes = 16
    in_dim = 8
    out_dim = 64          # BatchNorm1d(64) fixes the GNN output width
    frames = batch_size * time_len

    key = jax.random.PRNGKey(0)
    k_x, k_a, k_w, k_g, k_b, k_m, k_v, k_p = jax.random.split(key, 8)

    # inputs: node features per frame + shared (row-normalized) adjacency
    x = jax.random.normal(k_x, (frames, num_nodes, in_dim), dtype=jnp.float32)
    a = jax.random.uniform(k_a, (num_nodes, num_nodes), dtype=jnp.float32)
    adj = a / jnp.sum(a, axis=-1, keepdims=True)

    # deterministic parameters
    w = jax.random.normal(k_w, (in_dim, out_dim), dtype=jnp.float32) * 0.1
    gamma = 1.0 + 0.1 * jax.random.normal(k_g, (1, out_dim), dtype=jnp.float32)
    beta = 0.1 * jax.random.normal(k_b, (1, out_dim), dtype=jnp.float32)
    run_mean = 0.1 * jax.random.normal(k_m, (1, out_dim), dtype=jnp.float32)
    run_var = 1.0 + 0.1 * jax.random.uniform(k_v, (1, out_dim), dtype=jnp.float32)
    # pool_weight: xavier_uniform_ on shape (out_dim, 1)
    bound = float(np.sqrt(6.0 / (out_dim + 1)))
    pool_w = jax.random.uniform(k_p, (out_dim, 1), dtype=jnp.float32,
                                minval=-bound, maxval=bound)

    for average in (False, True):
        out = gnn_for_frames_forward(x, adj, w, gamma, beta, run_mean, run_var,
                                     pool_w, batch_size, time_len, average=average)
        out = jax.block_until_ready(out)
        ref = reference_forward(x, adj, w, gamma, beta, run_mean, run_var,
                                pool_w, batch_size, time_len, average=average)
        assert out.shape == (batch_size, time_len, num_nodes), out.shape
        np.testing.assert_allclose(np.asarray(out), np.asarray(ref),
                                   rtol=1e-4, atol=1e-4)

    print("KERNEL_OK")
</pallas_src>

<mosaic_0001>
module attributes {stable_mosaic.version = 11 : i64} {
  func.func @gnn_frames_kernel(%arg0: i32, %arg1: memref<8x16x8xf32, #tpu.memory_space<vmem>>, %arg2: memref<16x16xf32, #tpu.memory_space<vmem>>, %arg3: memref<8x64xf32, #tpu.memory_space<vmem>>, %arg4: memref<8x64xf32, #tpu.memory_space<vmem>>, %arg5: memref<1x1x128xf32, #tpu.memory_space<vmem>>) attributes {dimension_semantics = [#tpu.dimension_semantics<parallel>], iteration_bounds = array<i64: 2>, scalar_prefetch = 0 : i64, scratch_operands = 0 : i64, tpu.core_type = #tpu.core_type<tc>, window_params = [{transform_indices = @transform_0, window_bounds = array<i64: 8, 16, 8>}, {pipeline_mode = #tpu.pipeline_mode<synchronous>, transform_indices = @transform_1, window_bounds = array<i64: 16, 16>}, {pipeline_mode = #tpu.pipeline_mode<synchronous>, transform_indices = @transform_2, window_bounds = array<i64: 8, 64>}, {pipeline_mode = #tpu.pipeline_mode<synchronous>, transform_indices = @transform_3, window_bounds = array<i64: 8, 64>}, {transform_indices = @transform_4, window_bounds = array<i64: 1, 1, 128>}]} {
    %c0 = arith.constant 0 : index
    %c0_0 = arith.constant 0 : index
    %c0_1 = arith.constant 0 : index
    %0 = vector.load %arg1[%c0, %c0_0, %c0_1] : memref<8x16x8xf32, #tpu.memory_space<vmem>>, vector<8x16x8xf32>
    %c0_2 = arith.constant 0 : index
    %c0_3 = arith.constant 0 : index
    %1 = vector.load %arg3[%c0_2, %c0_3] : memref<8x64xf32, #tpu.memory_space<vmem>>, vector<8x64xf32>
    %c0_4 = arith.constant 0 : index
    %c0_5 = arith.constant 0 : index
    %2 = vector.load %arg2[%c0_4, %c0_5] : memref<16x16xf32, #tpu.memory_space<vmem>>, vector<16x16xf32>
    %3 = vector.shape_cast %0 : vector<8x16x8xf32> to vector<128x8xf32>
    %cst = arith.constant dense<0.000000e+00> : vector<128x64xf32>
    %4 = tpu.matmul %3, %1, %cst {dimension_numbers = #tpu.dot_dimension_numbers<[1], [0], [0], [1], [0, 0, 1, 1], [], []>} : vector<128x8xf32>, vector<8x64xf32>, vector<128x64xf32> -> vector<128x64xf32>
    %5 = vector.shape_cast %4 : vector<128x64xf32> to vector<8x16x64xf32>
    %6 = vector.shape_cast %2 : vector<16x16xf32> to vector<1x16x16xf32>
    %7 = vector.broadcast %6 : vector<1x16x16xf32> to vector<8x16x16xf32>
    %cst_6 = arith.constant dense<0.000000e+00> : vector<8x16x64xf32>
    %8 = tpu.matmul %7, %5, %cst_6 {dimension_numbers = #tpu.dot_dimension_numbers<[2], [1], [1], [2], [0, 0, 0, 1, 1, 2], [0], [0]>} : vector<8x16x16xf32>, vector<8x16x64xf32>, vector<8x16x64xf32> -> vector<8x16x64xf32>
    %cst_7 = arith.constant 0.000000e+00 : f32
    %9 = vector.broadcast %cst_7 : f32 to vector<8x16x64xf32>
    %10 = arith.maximumf %8, %9 : vector<8x16x64xf32>
    %11 = vector.shape_cast %10 : vector<8x16x64xf32> to vector<128x64xf32>
    %c0_8 = arith.constant 0 : index
    %c0_9 = arith.constant 0 : index
    %12 = vector.load %arg4[%c0_8, %c0_9] : memref<8x64xf32, #tpu.memory_space<vmem>>, vector<8x64xf32>
    %cst_10 = arith.constant dense<0.000000e+00> : vector<8x128xf32>
    %13 = tpu.matmul %12, %11, %cst_10 {dimension_numbers = #tpu.dot_dimension_numbers<[1], [1], [0], [0], [0, 0, 1, 0], [], []>} : vector<8x64xf32>, vector<128x64xf32>, vector<8x128xf32> -> vector<8x128xf32>
    %c1 = arith.constant 1 : index
    %c0_11 = arith.constant 0 : index
    %14 = vector.load %arg4[%c1, %c0_11] : memref<8x64xf32, #tpu.memory_space<vmem>>, vector<1x64xf32>
    %15 = vector.shape_cast %14 : vector<1x64xf32> to vector<1x1x64xf32>
    %cst_12 = arith.constant dense<0.000000e+00> : vector<1xf32>
    %16 = vector.multi_reduction <add>, %15, %cst_12 [1, 2] : vector<1x1x64xf32> to vector<1xf32>
    %17 = vector.shape_cast %16 : vector<1xf32> to vector<1x1x1xf32>
    %18 = vector.extract %17[0, 0, 0] : f32 from vector<1x1x1xf32>
    %19 = vector.extract_strided_slice %13 {offsets = [0, 0], sizes = [1, 128], strides = [1, 1]} : vector<8x128xf32> to vector<1x128xf32>
    %20 = vector.broadcast %18 : f32 to vector<1x128xf32>
    %21 = arith.addf %19, %20 : vector<1x128xf32>
    %22 = vector.shape_cast %21 : vector<1x128xf32> to vector<1x1x128xf32>
    %c0_13 = arith.constant 0 : index
    %c0_14 = arith.constant 0 : index
    %c0_15 = arith.constant 0 : index
    %23 = vector.load %arg5[%c0_13, %c0_14, %c0_15] : memref<1x1x128xf32, #tpu.memory_space<vmem>>, vector<1x1x128xf32>
    tpu.vector_store %arg5[%c0_13, %c0_14, %c0_15], %22 {strides = array<i32>} : memref<1x1x128xf32, #tpu.memory_space<vmem>>, vector<1x1x128xf32>,
    return
  }
  func.func @transform_0(%arg0: i32) -> (i32, i32, i32) {
    %c0_i32 = arith.constant 0 : i32
    %c0_i32_0 = arith.constant 0 : i32
    %c0_i32_1 = arith.constant 0 : i32
    return %arg0, %c0_i32, %c0_i32_0 : i32, i32, i32
  }
  func.func @transform_1(%arg0: i32) -> (i32, i32) {
    %c0_i32 = arith.constant 0 : i32
    %c0_i32_0 = arith.constant 0 : i32
    %c0_i32_1 = arith.constant 0 : i32
    return %c0_i32, %c0_i32_0 : i32, i32
  }
  func.func @transform_2(%arg0: i32) -> (i32, i32) {
    %c0_i32 = arith.constant 0 : i32
    %c0_i32_0 = arith.constant 0 : i32
    %c0_i32_1 = arith.constant 0 : i32
    return %c0_i32, %c0_i32_0 : i32, i32
  }
  func.func @transform_3(%arg0: i32) -> (i32, i32) {
    %c0_i32 = arith.constant 0 : i32
    %c0_i32_0 = arith.constant 0 : i32
    %c0_i32_1 = arith.constant 0 : i32
    return %c0_i32, %c0_i32_0 : i32, i32
  }
  func.func @transform_4(%arg0: i32) -> (i32, i32, i32) {
    %c0_i32 = arith.constant 0 : i32
    %c0_i32_0 = arith.constant 0 : i32
    %c0_i32_1 = arith.constant 0 : i32
    return %arg0, %c0_i32, %c0_i32_0 : i32, i32, i32
  }
}

</mosaic_0001>

<bundles_post_ra>
// kernel: tpu_custom_call.1
= control target key start
LH: loop header
LB: loop body
LE: loop exit
PB: predicated region body
PF: predicated region fallthrough
CT: control target
= control target key end

     0   :  { %9 = vsyncpa [#allocation3], 0  ;;  %s1881_s0 = inlined_call_operand.vmem [shape: f32[16,16,8], index: 0, kind: input, shape index: {}]   ;;  %s1882_s1 = inlined_call_operand.vmem [shape: f32[16,16], index: 1, kind: input, shape index: {}]   ;;  %s1883_s2 = inlined_call_operand.vmem [shape: f32[8,64], index: 2, kind: input, shape index: {}]   ;;  %s1884_s3 = inlined_call_operand.vmem [shape: f32[8,64], index: 3, kind: input, shape index: {}]   ;;  %s1885_s4 = inlined_call_operand.hbm [shape: f32[2,1,128], index: 4, kind: output, shape index: {}]  }
   0x1   :  { %11 = vsyncpa [#allocation3 + $0x1], 0  ;;  %s1686_s15 = smov 0   ;;  %s1688_s16 = smov 0  }
   0x2   :  { %s1690_s17 = smov 0   ;;  %s1692_s18 = smov 0  }
   0x3 LB: > { %s1707_s19 = sadd.s32 4294967295, %s1655_s18   ;;  %s1242_s20 = sadd.s32 4294967294, %s1655_s18   ;;  %s1655_s18 = sphi %s1692_s18, %s1893_s18   ;;  %s1651_s17 = sphi %s1690_s17, %s1892_s17   ;;  %s1647_s16 = sphi %s1688_s16, %s1891_s16   ;;  %s1643_s15 = sphi %s1686_s15, %s1890_s15  }
   0x4   : > { %s1711_s21 = sadd.s32 1, %s1655_s18   ;;  %s113_s22 = sadd.s32 1, %s1651_s17 }
   0x5   : > { %s110_s23 = ssub.s32 %s1655_s18, %s1711_s21  ;;  %p123_p0 = scmp.ne.s32.totalorder %s1651_s17, %s1647_s16 }
   0x6   : > { %p111_p1 = scmp.eq.s32.totalorder %s110_s23, 0  ;;  %p124_p2 = scmp.eq.s32.totalorder %s1707_s19, 1 }
   0x7   : > { %p129_p3 = scmp.ne.s32.totalorder %s1647_s16, %s1643_s15  ;;  %p130_p4 = scmp.eq.s32.totalorder %s1242_s20, 1 }
   0x8   : > { %s1722_s24 = scalar_select %p111_p1, %s1651_s17, %s113_s22  }
   0x9   : > { %p1724_p5 = por %p124_p2, %p123_p0  ;;  %p1728_p6 = por %p130_p4, %p129_p3 }
   0xa   : > { %p1245_p7 = scmp.ge.s32.totalorder %s1655_s18, 1  ;;  %p167_p8 = scmp.lt.s32.totalorder %s1655_s18, 3 }
   0xc   : > { %p168_p9 = pnand %p1245_p7, %p167_p8 }
   0xd   : > { %v216_v0 = vld [vmem:[%s1883_s2] sm:$0xff] (!%p168_p9)  ;;  %s1246_s29 = sshll.u32 (!%p168_p9), %s1707_s19, 3  ;;  %vm219_vm0 = vcmask (!%p168_p9), 64512   ;;  %vm413_vm1 = vcmask (!%p168_p9), 130048   ;;  %v218_v22 = vld [vmem:[%s1882_s1 + $0x8] sm:$0xff] (!%p168_p9)  ;;  %v1657_v43 = vmov (!%p168_p9), 0.0|0.0  }
   0xe   : > { %171 = sbr.rel (%p168_p9) target bundleno = 753 (0x2f1), region = 36  ;;  %1368 = vmatprep.subr.mxu1 (!%p168_p9), %v216_v0  ;;  %p194_p10 = scmp.lt.s32.totalorder (!%p168_p9), %s1246_s29, 15  ;;  %v217_v17 = vld [vmem:[%s1882_s1] sm:$0xff] (!%p168_p9)  ;;  %1517 = vmatprep.subr.bf16.mxu0 (!%p168_p9), %v1657_v43  ;;  %vm1658_vm2 = vmmov (!%p168_p9), 0   ;;  %v1659_v44 = vmov (!%p168_p9), 0.0   ;;  %vm1160_vm3 = vcmask (!%p168_p9), 516096  }
   0xf   : > { %1369 = vmatpush3.msra.mxu1 (!%p168_p9), %v216_v0  ;;  %1482 = vmatprep.mubr.msk.f32.mxu0 (!%p168_p9), %vm1658_vm2, %v1659_v44  ;;  %v1159_v45 = vld [vmem:[%s1884_s3 + $0x1] sm:$0x1] (!%p168_p9)  ;;  %vm1037_vm4 = vcmask (!%p168_p9), 523264   ;;  %s191_s22 = sand.u32 (!%p168_p9), 1, %s1647_s16   ;;  %s1298_s27 = sshll.u32 (!%p168_p9), %s1707_s19, 4 }
  0x10   : > { %v1161_v46 = vsel (!%p168_p9), %vm1160_vm3, %v1159_v45, 0.0  ;;  %vm1803_vm5 = vmpackc.low (!%p168_p9), %vm1037_vm4, %vm1037_vm4  ;;  %s192_s28 = scalar_lea.vmem (!%p168_p9), [#allocation2], %s191_s22  ;;  %s1839_s6 = scalar_lea.hbm (!%p168_p9), %s1885_s4, %s1298_s27 }
  0x11   : > { %1162 = vadd.xlane.f32.xlu0 (!%p168_p9), %v1161_v46  ;;  %s1660_s19 = smov (!%p168_p9), [#allocation2]  }
  0x12   : > { %s1597_s9 = sshll.u32 (!%p168_p9), %s1660_s19, 4  ;;  %s1598_s9 = int_to_ptr.vmem [resolvable:$false] %s1597_s9 }
  0x13   : > { %s1599_s10 = scalar_lea.vmem (!%p168_p9), %s1598_s9, 32 }
  0x15   : > { %s1895_s29 = smov (!%p194_p10, %s1246_s29), 15 }
  0x16   : > { %s1301_s30 = sshll.u32 %s1895_s29, 4  ;;  %s1187_s29 = sshll.u32 %s192_s28, 4  ;;  %s1841_s29 = int_to_ptr.vmem [resolvable:$true] %s1187_s29 }
  0x17   : > { %s1741_s7 = scalar_lea.vmem %s1881_s0, %s1301_s30  ;;  %s1593_s8 = scalar_lea.vmem %s1841_s29, 16 }
  0x18   : > { %v200_v1 = vld [vmem:[%s1741_s7] sm:$0xff]  ;;  %v201_v2 = vld [vmem:[%s1741_s7 + $0x8] sm:$0xff]  ;;  %v202_v3 = vld [vmem:[%s1741_s7 + $0x10] sm:$0xff]  ;;  %p1594_p11 = scmp.ne.s32.totalorder %s1841_s29, %s1593_s8  ;;  %p1600_p0 = scmp.lt.s32.totalorder %s1841_s29, %s1598_s9 }
  0x19   : > { %1370 = vmatprep.mubr.msk.f32.mxu1 %vm219_vm0, %v200_v1  ;;  %v203_v4 = vld [vmem:[%s1741_s7 + $0x18] sm:$0xff]  ;;  %v204_v5 = vld [vmem:[%s1741_s7 + $0x20] sm:$0xff]  ;;  %v205_v6 = vld [vmem:[%s1741_s7 + $0x28] sm:$0xff]  ;;  %p1601_p1 = scmp.lt.s32.totalorder %s1599_s10, %s1593_s8 }
  0x1a   : > { %1371 = vmatmul.mubr.msk.f32.vlgmr.msra.gmra.mrb[0].mxu1 %vm219_vm0, %v201_v2  ;;  %v206_v7 = vld [vmem:[%s1741_s7 + $0x30] sm:$0xff]  ;;  %v207_v8 = vld [vmem:[%s1741_s7 + $0x38] sm:$0xff]  ;;  %v208_v9 = vld [vmem:[%s1741_s7 + $0x40] sm:$0xff]  ;;  %p1595_p12 = pnand %p1594_p11, %p1724_p5 }
  0x1b   : > { %1373 = vmatprep.mubr.msk.f32.mxu1 %vm219_vm0, %v202_v3  ;;  %v209_v10 = vld [vmem:[%s1741_s7 + $0x48] sm:$0xff]  ;;  %v210_v11 = vld [vmem:[%s1741_s7 + $0x50] sm:$0xff]  ;;  %v211_v12 = vld [vmem:[%s1741_s7 + $0x58] sm:$0xff]  ;;  %p1602_p2 = por %p1601_p1, %p1600_p0 }
  0x1c   : > { %v212_v13 = vld [vmem:[%s1741_s7 + $0x60] sm:$0xff]  ;;  %v213_v14 = vld [vmem:[%s1741_s7 + $0x68] sm:$0xff]  ;;  %v214_v15 = vld [vmem:[%s1741_s7 + $0x70] sm:$0xff]  ;;  %p1596_p13 = pneg %p1595_p12 }
  0x1d   : > { %v215_v16 = vld [vmem:[%s1741_s7 + $0x78] sm:$0xff]  ;;  %s1175_s7 = scalar_lea.sflag [#allocation3], %s191_s22 }
  0x1e   : > { %1374 = vmatmul.mubr.msk.f32.gmra.mrb[2].mxu1 %vm219_vm0, %v203_v4  ;;  %p1603_p3 = pnand %p1602_p2, %p1596_p13 }
  0x1f   : > { %1376 = vmatprep.mubr.msk.f32.mxu1 %vm219_vm0, %v204_v5 }
  0x22   : > { %1377 = vmatmul.mubr.msk.f32.gmra.mrb[4].mxu1 %vm219_vm0, %v205_v6 }
  0x23   : > { %1379 = vmatprep.mubr.msk.f32.mxu1 %vm219_vm0, %v206_v7 }
  0x26   : > { %1380 = vmatmul.mubr.msk.f32.gmra.mrb[6].mxu1 %vm219_vm0, %v207_v8 }
  0x27   : > { %1382 = vmatprep.mubr.msk.f32.mxu1 %vm219_vm0, %v208_v9 }
  0x2a   : > { %1383 = vmatmul.mubr.msk.f32.gmra.mrb[8].mxu1 %vm219_vm0, %v209_v10 }
  0x2b   : > { %1385 = vmatprep.mubr.msk.f32.mxu1 %vm219_vm0, %v210_v11 }
  0x2e   : > { %1386 = vmatmul.mubr.msk.f32.gmra.mrb[10].mxu1 %vm219_vm0, %v211_v12 }
  0x2f   : > { %1388 = vmatprep.mubr.msk.f32.mxu1 %vm219_vm0, %v212_v13 }
  0x32   : > { %1389 = vmatmul.mubr.msk.f32.gmra.mrb[12].mxu1 %vm219_vm0, %v213_v14 }
  0x33   : > { %1391 = vmatprep.mubr.msk.f32.mxu1 %vm219_vm0, %v214_v15 }
  0x36   : > { %1392 = vmatmul.mubr.msk.f32.gmra.mrb[14].mxu1 %vm219_vm0, %v215_v16 }
  0x37   : > { %1398 = vmatprep.mubr.msk.f32.mxu1 %vm413_vm1, %v217_v17 }
  0xed   : > { %v1372_v18 = vpop.f32.mrb[0].mxu1 }
  0xee   : > { %v334_v19 = vpop.f32.mrb[1].mxu1 }
  0xef   : > { %v1485_v20 = vpack.c.bf16 %v1372_v18, %v334_v19 }
  0xf1   : > { %1486 = vmatprep.subr.bf16.mxu1 %v1485_v20  ;;  %v1375_v21 = vpop.f32.mrb[2].mxu1 }
  0xf2   : > { %1488 = vmatpush3.bf16.msra.mxu1 %v1485_v20  ;;  %v344_v23 = vpop.f32.mrb[3].mxu1 }
  0xf3   : > { %v1489_v24 = vpack.c.bf16 %v1375_v21, %v344_v23 }
  0xf5   : > { %1399 = vmatmul.mubr.msk.f32.vlgmr.msra.gmra.mrb[16].mxu1 %vm413_vm1, %v218_v22  ;;  %1490 = vmatprep.subr.bf16.mxu1 %v1489_v24  ;;  %v1378_v25 = vpop.f32.mrb[4].mxu1 }
  0xf6   : > { %1492 = vmatpush3.bf16.msra.mxu1 %v1489_v24  ;;  %1405 = vmatprep.mubr.msk.f32.mxu1 %vm413_vm1, %v217_v17  ;;  %v354_v26 = vpop.f32.mrb[5].mxu1  ;;  %v1036_v24 = vld [vmem:[%s1884_s3] sm:$0xff] }
  0xf7   : > { %v1493_v27 = vpack.c.bf16 %v1378_v25, %v354_v26  ;;  %v1163_v25 = vpop.xlane.xlu0 %1162 }
  0xf8   : > { %v1164_v26 = vrot.slane %v1163_v25, 4 }
  0xf9   : > { %1406 = vmatmul.mubr.msk.f32.vlgmr.msra.gmra.mrb[18].mxu1 %vm413_vm1, %v218_v22  ;;  %1494 = vmatprep.subr.bf16.mxu1 %v1493_v27  ;;  %v1381_v28 = vpop.f32.mrb[6].mxu1 }
  0xfa   : > { %1496 = vmatpush3.bf16.msra.mxu1 %v1493_v27  ;;  %1412 = vmatprep.mubr.msk.f32.mxu1 %vm413_vm1, %v217_v17  ;;  %v364_v29 = vpop.f32.mrb[7].mxu1  ;;  %v1165_v27 = vadd.f32 %v1164_v26, %v1163_v25 }
  0xfb   : > { %v1497_v30 = vpack.c.bf16 %v1381_v28, %v364_v29 }
  0xfc   : > { %v1166_v28 = vrot.slane %v1165_v27, 2 }
  0xfd   : > { %1413 = vmatmul.mubr.msk.f32.vlgmr.msra.gmra.mrb[20].mxu1 %vm413_vm1, %v218_v22  ;;  %1498 = vmatprep.subr.bf16.mxu1 %v1497_v30  ;;  %v1384_v31 = vpop.f32.mrb[8].mxu1 }
  0xfe   : > { %1500 = vmatpush3.bf16.msra.mxu1 %v1497_v30  ;;  %1419 = vmatprep.mubr.msk.f32.mxu1 %vm413_vm1, %v217_v17  ;;  %v374_v32 = vpop.f32.mrb[9].mxu1  ;;  %v1167_v29 = vadd.f32 %v1166_v28, %v1165_v27 }
  0xff   : > { %v1501_v33 = vpack.c.bf16 %v1384_v31, %v374_v32 }
 0x100   : > { %v1168_v30 = vrot.slane %v1167_v29, 1 }
 0x101   : > { %1420 = vmatmul.mubr.msk.f32.vlgmr.msra.gmra.mrb[22].mxu1 %vm413_vm1, %v218_v22  ;;  %1502 = vmatprep.subr.bf16.mxu1 %v1501_v33  ;;  %v1387_v34 = vpop.f32.mrb[10].mxu1 }
 0x102   : > { %1504 = vmatpush3.bf16.msra.mxu1 %v1501_v33  ;;  %1426 = vmatprep.mubr.msk.f32.mxu1 %vm413_vm1, %v217_v17  ;;  %v384_v35 = vpop.f32.mrb[11].mxu1  ;;  %v1169_v31 = vadd.f32 %v1168_v30, %v1167_v29 }
 0x103   : > { %v1505_v36 = vpack.c.bf16 %v1387_v34, %v384_v35 }
 0x104   : > { %1549 = vpush %v1169_v31 }
 0x105   : > { %1427 = vmatmul.mubr.msk.f32.vlgmr.msra.gmra.mrb[24].mxu1 %vm413_vm1, %v218_v22  ;;  %1506 = vmatprep.subr.bf16.mxu1 %v1505_v36  ;;  %v1390_v37 = vpop.f32.mrb[12].mxu1 }
 0x106   : > { %1508 = vmatpush3.bf16.msra.mxu1 %v1505_v36  ;;  %1433 = vmatprep.mubr.msk.f32.mxu1 %vm413_vm1, %v217_v17  ;;  %v394_v38 = vpop.f32.mrb[13].mxu1 }
 0x107   : > { %v1509_v39 = vpack.c.bf16 %v1390_v37, %v394_v38 }
 0x109   : > { %1434 = vmatmul.mubr.msk.f32.vlgmr.msra.gmra.mrb[26].mxu1 %vm413_vm1, %v218_v22  ;;  %1510 = vmatprep.subr.bf16.mxu1 %v1509_v39  ;;  %v1393_v40 = vpop.f32.mrb[14].mxu1 }
 0x10a   : > { %1512 = vmatpush3.bf16.msra.mxu1 %v1509_v39  ;;  %1440 = vmatprep.mubr.msk.f32.mxu1 %vm413_vm1, %v217_v17  ;;  %v404_v41 = vpop.f32.mrb[15].mxu1 }
 0x10b   : > { %v1513_v42 = vpack.c.bf16 %v1393_v40, %v404_v41 }
 0x10d   : > { %1441 = vmatmul.mubr.msk.f32.vlgmr.msra.gmra.mrb[28].mxu1 %vm413_vm1, %v218_v22  ;;  %1514 = vmatprep.subr.bf16.mxu1 %v1513_v42 }
 0x10e   : > { %1516 = vmatpush3.bf16.msra.mxu1 %v1513_v42  ;;  %1447 = vmatprep.mubr.msk.f32.mxu1 %vm413_vm1, %v217_v17 }
 0x111   : > { %1448 = vmatmul.mubr.msk.f32.vlgmr.msra.gmra.mrb[30].mxu1 %vm413_vm1, %v218_v22 }
 0x135   : > { %s1550_s23 = spop %1549 }
 0x136   : > { %v1171_v32 = vstv %s1550_s23 }
 0x1c8   : > { %v1400_v47 = vpop.f32.mrb[16].mxu1 }
 0x1c9   : > { %v1021_v48 = vmax.f32 %v1400_v47, 0.0  ;;  %v486_v49 = vpop.f32.mrb[17].mxu1 }
 0x1ca   : > { %v1020_v50 = vmax.f32 %v486_v49, 0.0 }
 0x1cc   : > { %v1518_v52 = vpack.c.bf16 %v1021_v48, %v1020_v50  ;;  %v1407_v53 = vpop.f32.mrb[18].mxu1 }
 0x1cd   : > { %v1023_v54 = vmax.f32 %v1407_v53, 0.0  ;;  %v561_v55 = vpop.f32.mrb[19].mxu1 }
 0x1ce   : > { %1520 = vmatpush3.bf16.xpose.msk.msra.mxu0 %vm1803_vm5, %v1518_v52  ;;  %v1022_v56 = vmax.f32 %v561_v55, 0.0 }
 0x1cf   : > { %1521 = vmatprep.subr.bf16.mxu0 %v1657_v43 }
 0x1d0   : > { %v1522_v57 = vpack.c.bf16 %v1023_v54, %v1022_v56  ;;  %v1414_v58 = vpop.f32.mrb[20].mxu1 }
 0x1d1   : > { %v1025_v59 = vmax.f32 %v1414_v58, 0.0  ;;  %v636_v60 = vpop.f32.mrb[21].mxu1 }
 0x1d2   : > { %v1024_v61 = vmax.f32 %v636_v60, 0.0 }
 0x1d4   : > { %v1526_v62 = vpack.c.bf16 %v1025_v59, %v1024_v61  ;;  %v1421_v63 = vpop.f32.mrb[22].mxu1 }
 0x1d5   : > { %v1027_v0 = vmax.f32 %v1421_v63, 0.0  ;;  %v711_v1 = vpop.f32.mrb[23].mxu1 }
 0x1d6   : > { %1524 = vmatpush3.bf16.xpose.msk.msra.mxu0 %vm1803_vm5, %v1522_v57  ;;  %v1026_v2 = vmax.f32 %v711_v1, 0.0 }
 0x1d7   : > { %1525 = vmatprep.subr.bf16.mxu0 %v1657_v43 }
 0x1d8   : > { %v1530_v3 = vpack.c.bf16 %v1027_v0, %v1026_v2  ;;  %v1428_v4 = vpop.f32.mrb[24].mxu1 }
 0x1d9   : > { %v1029_v5 = vmax.f32 %v1428_v4, 0.0  ;;  %v786_v6 = vpop.f32.mrb[25].mxu1 }
 0x1da   : > { %v1028_v7 = vmax.f32 %v786_v6, 0.0 }
 0x1dc   : > { %v1534_v8 = vpack.c.bf16 %v1029_v5, %v1028_v7  ;;  %v1435_v9 = vpop.f32.mrb[26].mxu1 }
 0x1dd   : > { %v1031_v10 = vmax.f32 %v1435_v9, 0.0  ;;  %v861_v11 = vpop.f32.mrb[27].mxu1 }
 0x1de   : > { %1528 = vmatpush3.bf16.xpose.msk.msra.mxu0 %vm1803_vm5, %v1526_v62  ;;  %v1030_v12 = vmax.f32 %v861_v11, 0.0 }
 0x1df   : > { %1529 = vmatprep.subr.bf16.mxu0 %v1657_v43 }
 0x1e0   : > { %v1538_v13 = vpack.c.bf16 %v1031_v10, %v1030_v12  ;;  %v1442_v14 = vpop.f32.mrb[28].mxu1 }
 0x1e1   : > { %v1033_v15 = vmax.f32 %v1442_v14, 0.0  ;;  %v936_v16 = vpop.f32.mrb[29].mxu1 }
 0x1e2   : > { %v1032_v17 = vmax.f32 %v936_v16, 0.0 }
 0x1e4   : > { %v1542_v18 = vpack.c.bf16 %v1033_v15, %v1032_v17  ;;  %v1449_v19 = vpop.f32.mrb[30].mxu1 }
 0x1e5   : > { %v1035_v20 = vmax.f32 %v1449_v19, 0.0  ;;  %v1011_v21 = vpop.f32.mrb[31].mxu1 }
 0x1e6   : > { %1532 = vmatpush3.bf16.xpose.msk.msra.mxu0 %vm1803_vm5, %v1530_v3  ;;  %v1034_v22 = vmax.f32 %v1011_v21, 0.0 }
 0x1e7   : > { %1533 = vmatprep.subr.bf16.mxu0 %v1657_v43 }
 0x1e8   : > { %v1546_v23 = vpack.c.bf16 %v1035_v20, %v1034_v22 }
 0x1ee   : > { %1536 = vmatpush3.bf16.xpose.msk.msra.mxu0 %vm1803_vm5, %v1534_v8 }
 0x1ef   : > { %1537 = vmatprep.subr.bf16.mxu0 %v1657_v43 }
 0x1f6   : > { %1540 = vmatpush3.bf16.xpose.msk.msra.mxu0 %vm1803_vm5, %v1538_v13 }
 0x1f7   : > { %1541 = vmatprep.subr.bf16.mxu0 %v1657_v43 }
 0x1fe   : > { %1544 = vmatpush3.bf16.xpose.msk.msra.mxu0 %vm1803_vm5, %v1542_v18 }
 0x1ff   : > { %1545 = vmatprep.subr.bf16.mxu0 %v1657_v43 }
 0x206   : > { %1548 = vmatpush3.bf16.xpose.msk.msra.mxu0 %vm1803_vm5, %v1546_v23 }
 0x20d   : > { %1483 = vmatmul.mubr.msk.f32.vlgmr.msra.gmra.mrb[0].mxu0 %vm1037_vm4, %v1036_v24 }
 0x2e0   : > { %v1155_v33 = vpop.f32.mrb[0].mxu0 }
 0x2e1   : > { %v1172_v34 = vadd.f32 %v1171_v32, %v1155_v33  ;;  %v1484_v35 = vpop.f32.mrb[1].mxu0 }
 0x2e3   : > { %1173 = vst [vmem:[%s192_s28] sm:$0x1] %v1172_v34 }
 0x2e4   : > { %1606 = shalt.err (!%p1603_p3)
}
 0x2e5   : > { %s1607_s11 = scalar_lea.hbm %s1839_s6, 16  ;;  %s1611_s14 = scalar_lea.hbm %s1885_s4, 32 }
 0x2e6   : > { %p1608_p4 = scmp.ne.s32.totalorder %s1839_s6, %s1607_s11  ;;  %p1612_p9 = scmp.lt.u32.totalorder %s1839_s6, %s1885_s4 }
 0x2e7   : > { %p1613_p10 = scmp.lt.u32.totalorder %s1611_s14, %s1607_s11  ;;  %p1615_p12 = scmp.lt.u32.totalorder %s1607_s11, %s1839_s6 }
 0x2e8   : > { %p1609_p7 = pnand %p1608_p4, %p1724_p5 }
 0x2e9   : > { %p1614_p11 = por %p1613_p10, %p1612_p9 }
 0x2ea   : > { %p1610_p8 = pneg %p1609_p7 }
 0x2eb   : > { %p1616_p13 = por %p1615_p12, %p1614_p11 }
 0x2ed   : > { %p1617_p0 = pnand %p1616_p13, %p1610_p8 }
 0x2ef   : > { %1620 = shalt.err (!%p1617_p0)
}
 0x2f0   : > { %1551 = dma.vmem_to_hbm [thread:$0]  (%p1724_p5), %s1841_s29, 16, %s1839_s6, %s1175_s7  }
 0x2f1 PF: > { %p1557_p1 = scmp.ge.s32.totalorder %s1655_s18, 2  ;;  %s1199_s23 = sand.u32 1, %s1643_s15  }
 0x2f2   : > { %s1200_s27 = scalar_lea.sflag [#allocation3], %s1199_s23 }
 0x2f3   : > { %p1554_p2 = pnand %p1557_p1, %p1728_p6 }
 0x2f5   : > { %1638 = dma.done.wait (!%p1554_p2), %s1200_s27, 16  }
 0x2f6   : > { %1640 = vsyncadd (!%p1554_p2), %s1200_s27, 4294967280  ;;  %p14_p3 = scmp.ge.s32.totalorder %s1711_s21, 4   ;;  %s1890_s15 = smov %s1647_s16 }
 0x2f7   : > { %s1891_s16 = smov %s1651_s17  ;;  %s1892_s17 = smov %s1722_s24 }
 0x2f8   : > { %s1893_s18 = smov %s1711_s21  ;;  %16 = sbr.rel (!%p14_p3) target bundleno = 3 (0x3), region = 71 }
 0x2ff   :  { %1204 = vsyncpa [#allocation3], 1 }
 0x300   :  { %1206 = vsyncpa [#allocation3 + $0x1], 1 }

</bundles_post_ra>
